<compile_context>
chip_gen: v6e
topology: v6e:2x2x1
jax: 0.10.0
libtpu: 0.0.40
codegen_flags: <defaults>
</compile_context>

<pallas_src>
import functools

import numpy as np

import jax
import jax.numpy as jnp
from jax.experimental import pallas as pl
from jax.experimental.pallas import tpu as pltpu


def _gaussian_smearing_kernel(dist_ref, out_ref, *, coeff, offsets):
    # dist_ref: (8, bm8)      sublane+lane-dense block of flattened distances
    # out_ref : (G, 8, bm8)   one dense (8, bm8) slab per Gaussian center
    d = dist_ref[...]                                  # f32 (8, bm8)
    for g, off in enumerate(offsets):                  # unrolled, G is tiny
        diff = d - off
        out_ref[g, :, :] = jnp.exp(coeff * diff * diff).astype(out_ref.dtype)


def gaussian_smearing(dist, *, start=0.0, stop=1.0, num_gaussians=6,
                      block_m=262144, transpose_output=True,
                      out_dtype=jnp.float32):
    """Equivalent of GaussianSmearing.forward.

    dist: any shape; flattened to M = dist.size elements.
    Returns (M, num_gaussians) by default (PyTorch layout, costs one extra
    output transpose pass); pass transpose_output=False to get the
    lane-dense (num_gaussians, M) kernel result with no extra HBM pass.
    """
    G = int(num_gaussians)
    assert G >= 2, "num_gaussians must be >= 2 (module divides by offset[1]-offset[0])"
    # Compile-time constants, matching the PyTorch buffer / coeff (f32 linspace).
    off_f32 = np.linspace(float(start), float(stop), G, dtype=np.float32)
    coeff = float(-0.5 / float(off_f32[1] - off_f32[0]) ** 2)
    offsets = tuple(float(o) for o in off_f32)

    flat = jnp.ravel(dist).astype(jnp.float32)
    M = flat.shape[0]

    # Sublane-dense (8, M/8) view.  Only a <8-element tail pad when needed.
    M_pad = ((M + 7) // 8) * 8
    if M_pad != M:
        flat = jnp.pad(flat, (0, M_pad - M))
    M8 = M_pad // 8
    x = flat.reshape(8, M8)

    # Lane-axis tile size (columns of the (8, M8) view).
    bm8 = max(1, block_m // 8)
    if M8 <= bm8:
        bm8 = M8                                   # one full-extent block
    else:
        bm8 = max(128, (bm8 // 128) * 128)         # keep (8,128) divisibility
    n_blocks = pl.cdiv(M8, bm8)
    # v7x: a 1-step 'parallel' grid idles one TensorCore; split mid-size M.
    if n_blocks == 1 and M8 > 2 * 128:
        bm8 = pl.cdiv(pl.cdiv(M8, 2), 128) * 128
        n_blocks = pl.cdiv(M8, bm8)

    # Double-buffered VMEM footprint: (input + G output slabs) of (8, bm8) f32.
    vmem_bytes = 2 * (1 + G) * 8 * bm8 * 4
    vmem_limit = min(64 * 1024 * 1024,
                     max(32 * 1024 * 1024, int(1.5 * vmem_bytes)))

    cost = pl.CostEstimate(
        flops=3 * G * M_pad,
        transcendentals=G * M_pad,
        bytes_accessed=4 * M_pad + jnp.dtype(out_dtype).itemsize * G * M_pad,
    )

    out_g8m = pl.pallas_call(
        functools.partial(_gaussian_smearing_kernel, coeff=coeff,
                          offsets=offsets),
        out_shape=jax.ShapeDtypeStruct((G, 8, M8), out_dtype),
        grid=(n_blocks,),
        in_specs=[pl.BlockSpec((8, bm8), lambda i: (0, i))],
        out_specs=pl.BlockSpec((G, 8, bm8), lambda i: (0, 0, i)),
        compiler_params=pltpu.CompilerParams(
            dimension_semantics=("parallel",),
            vmem_limit_bytes=vmem_limit),
        cost_estimate=cost,
    )(x)

    # Free row-major reshape: (G, 8, M8) -> (G, 8*M8) == (G, M_pad).
    out_gm = out_g8m.reshape(G, M_pad)
    if M_pad != M:
        out_gm = out_gm[:, :M]
    if not transpose_output:
        return out_gm        # lane-dense (G, M), no extra HBM pass
    return out_gm.T          # PyTorch layout (M, G): one extra output pass


def _reference(dist, *, start=0.0, stop=1.0, num_gaussians=6):
    # Pure-JAX reference matching the PyTorch module.
    offset = jnp.linspace(start, stop, num_gaussians, dtype=jnp.float32)
    coeff = -0.5 / float(offset[1] - offset[0]) ** 2
    d = dist.reshape(-1, 1).astype(jnp.float32) - offset.reshape(1, -1)
    return jnp.exp(coeff * d * d)


if __name__ == "__main__":
    # Module defaults: start=0.0, stop=1.0, num_gaussians=6.
    key = jax.random.PRNGKey(0)
    cases = [
        ((2, 300), {}),                 # small, single full-extent block
        ((1, 1003), {}),                # M not a multiple of 8 (tiny tail pad)
        ((6000,), {"block_m": 2048}),   # multi-step grid with ragged last block
    ]
    for idx, (shape, kw) in enumerate(cases):
        key, sub = jax.random.split(key)
        dist = jax.random.uniform(sub, shape, dtype=jnp.float32)
        out = jax.block_until_ready(gaussian_smearing(dist, **kw))
        ref = _reference(dist)
        assert out.shape == (dist.size, 6), (out.shape, dist.size)
        assert jnp.allclose(out, ref, atol=1e-5, rtol=1e-5), f"case {idx} mismatch"

    # Lane-dense fast path (no wrapper transpose) — same numbers, (G, M) layout.
    out_gm = jax.block_until_ready(
        gaussian_smearing(dist, transpose_output=False, block_m=2048))
    assert out_gm.shape == (6, dist.size)
    assert jnp.allclose(out_gm.T, ref, atol=1e-5, rtol=1e-5)

    print("KERNEL_OK")
</pallas_src>

<mosaic_0001>
module attributes {stable_mosaic.version = 11 : i64} {
  func.func @_gaussian_smearing_kernel(%arg0: i32, %arg1: memref<8x75xf32, #tpu.memory_space<vmem>>, %arg2: memref<6x8x75xf32, #tpu.memory_space<vmem>>) attributes {dimension_semantics = [#tpu.dimension_semantics<parallel>], iteration_bounds = array<i64: 1>, scalar_prefetch = 0 : i64, scratch_operands = 0 : i64, tpu.core_type = #tpu.core_type<tc>, window_params = [{transform_indices = @transform_0, window_bounds = array<i64: 8, 75>}, {transform_indices = @transform_1, window_bounds = array<i64: 6, 8, 75>}]} {
    %c0 = arith.constant 0 : index
    %c0_0 = arith.constant 0 : index
    %0 = vector.load %arg1[%c0, %c0_0] : memref<8x75xf32, #tpu.memory_space<vmem>>, vector<8x75xf32>
    %cst = arith.constant 0.000000e+00 : f32
    %1 = vector.broadcast %cst : f32 to vector<8x75xf32>
    %2 = arith.subf %0, %1 : vector<8x75xf32>
    %cst_1 = arith.constant -1.250000e+01 : f32
    %3 = vector.broadcast %cst_1 : f32 to vector<8x75xf32>
    %4 = arith.mulf %3, %2 : vector<8x75xf32>
    %5 = arith.mulf %4, %2 : vector<8x75xf32>
    %6 = math.exp %5 : vector<8x75xf32>
    %c0_2 = arith.constant 0 : index
    %c0_3 = arith.constant 0 : index
    %c0_4 = arith.constant 0 : index
    %7 = vector.load %arg2[%c0_2, %c0_3, %c0_4] : memref<6x8x75xf32, #tpu.memory_space<vmem>>, vector<1x8x75xf32>
    %8 = vector.shape_cast %7 : vector<1x8x75xf32> to vector<8x75xf32>
    %9 = vector.shape_cast %6 : vector<8x75xf32> to vector<1x8x75xf32>
    tpu.vector_store %arg2[%c0_2, %c0_3, %c0_4], %9 {strides = array<i32>} : memref<6x8x75xf32, #tpu.memory_space<vmem>>, vector<1x8x75xf32>,
    %cst_5 = arith.constant 2.000000e-01 : f32
    %10 = vector.broadcast %cst_5 : f32 to vector<8x75xf32>
    %11 = arith.subf %0, %10 : vector<8x75xf32>
    %cst_6 = arith.constant -1.250000e+01 : f32
    %12 = vector.broadcast %cst_6 : f32 to vector<8x75xf32>
    %13 = arith.mulf %12, %11 : vector<8x75xf32>
    %14 = arith.mulf %13, %11 : vector<8x75xf32>
    %15 = math.exp %14 : vector<8x75xf32>
    %c1 = arith.constant 1 : index
    %c0_7 = arith.constant 0 : index
    %c0_8 = arith.constant 0 : index
    %16 = vector.load %arg2[%c1, %c0_7, %c0_8] : memref<6x8x75xf32, #tpu.memory_space<vmem>>, vector<1x8x75xf32>
    %17 = vector.shape_cast %16 : vector<1x8x75xf32> to vector<8x75xf32>
    %18 = vector.shape_cast %15 : vector<8x75xf32> to vector<1x8x75xf32>
    tpu.vector_store %arg2[%c1, %c0_7, %c0_8], %18 {strides = array<i32>} : memref<6x8x75xf32, #tpu.memory_space<vmem>>, vector<1x8x75xf32>,
    %cst_9 = arith.constant 4.000000e-01 : f32
    %19 = vector.broadcast %cst_9 : f32 to vector<8x75xf32>
    %20 = arith.subf %0, %19 : vector<8x75xf32>
    %cst_10 = arith.constant -1.250000e+01 : f32
    %21 = vector.broadcast %cst_10 : f32 to vector<8x75xf32>
    %22 = arith.mulf %21, %20 : vector<8x75xf32>
    %23 = arith.mulf %22, %20 : vector<8x75xf32>
    %24 = math.exp %23 : vector<8x75xf32>
    %c2 = arith.constant 2 : index
    %c0_11 = arith.constant 0 : index
    %c0_12 = arith.constant 0 : index
    %25 = vector.load %arg2[%c2, %c0_11, %c0_12] : memref<6x8x75xf32, #tpu.memory_space<vmem>>, vector<1x8x75xf32>
    %26 = vector.shape_cast %25 : vector<1x8x75xf32> to vector<8x75xf32>
    %27 = vector.shape_cast %24 : vector<8x75xf32> to vector<1x8x75xf32>
    tpu.vector_store %arg2[%c2, %c0_11, %c0_12], %27 {strides = array<i32>} : memref<6x8x75xf32, #tpu.memory_space<vmem>>, vector<1x8x75xf32>,
    %cst_13 = arith.constant 6.000000e-01 : f32
    %28 = vector.broadcast %cst_13 : f32 to vector<8x75xf32>
    %29 = arith.subf %0, %28 : vector<8x75xf32>
    %cst_14 = arith.constant -1.250000e+01 : f32
    %30 = vector.broadcast %cst_14 : f32 to vector<8x75xf32>
    %31 = arith.mulf %30, %29 : vector<8x75xf32>
    %32 = arith.mulf %31, %29 : vector<8x75xf32>
    %33 = math.exp %32 : vector<8x75xf32>
    %c3 = arith.constant 3 : index
    %c0_15 = arith.constant 0 : index
    %c0_16 = arith.constant 0 : index
    %34 = vector.load %arg2[%c3, %c0_15, %c0_16] : memref<6x8x75xf32, #tpu.memory_space<vmem>>, vector<1x8x75xf32>
    %35 = vector.shape_cast %34 : vector<1x8x75xf32> to vector<8x75xf32>
    %36 = vector.shape_cast %33 : vector<8x75xf32> to vector<1x8x75xf32>
    tpu.vector_store %arg2[%c3, %c0_15, %c0_16], %36 {strides = array<i32>} : memref<6x8x75xf32, #tpu.memory_space<vmem>>, vector<1x8x75xf32>,
    %cst_17 = arith.constant 8.000000e-01 : f32
    %37 = vector.broadcast %cst_17 : f32 to vector<8x75xf32>
    %38 = arith.subf %0, %37 : vector<8x75xf32>
    %cst_18 = arith.constant -1.250000e+01 : f32
    %39 = vector.broadcast %cst_18 : f32 to vector<8x75xf32>
    %40 = arith.mulf %39, %38 : vector<8x75xf32>
    %41 = arith.mulf %40, %38 : vector<8x75xf32>
    %42 = math.exp %41 : vector<8x75xf32>
    %c4 = arith.constant 4 : index
    %c0_19 = arith.constant 0 : index
    %c0_20 = arith.constant 0 : index
    %43 = vector.load %arg2[%c4, %c0_19, %c0_20] : memref<6x8x75xf32, #tpu.memory_space<vmem>>, vector<1x8x75xf32>
    %44 = vector.shape_cast %43 : vector<1x8x75xf32> to vector<8x75xf32>
    %45 = vector.shape_cast %42 : vector<8x75xf32> to vector<1x8x75xf32>
    tpu.vector_store %arg2[%c4, %c0_19, %c0_20], %45 {strides = array<i32>} : memref<6x8x75xf32, #tpu.memory_space<vmem>>, vector<1x8x75xf32>,
    %cst_21 = arith.constant 1.000000e+00 : f32
    %46 = vector.broadcast %cst_21 : f32 to vector<8x75xf32>
    %47 = arith.subf %0, %46 : vector<8x75xf32>
    %cst_22 = arith.constant -1.250000e+01 : f32
    %48 = vector.broadcast %cst_22 : f32 to vector<8x75xf32>
    %49 = arith.mulf %48, %47 : vector<8x75xf32>
    %50 = arith.mulf %49, %47 : vector<8x75xf32>
    %51 = math.exp %50 : vector<8x75xf32>
    %c5 = arith.constant 5 : index
    %c0_23 = arith.constant 0 : index
    %c0_24 = arith.constant 0 : index
    %52 = vector.load %arg2[%c5, %c0_23, %c0_24] : memref<6x8x75xf32, #tpu.memory_space<vmem>>, vector<1x8x75xf32>
    %53 = vector.shape_cast %52 : vector<1x8x75xf32> to vector<8x75xf32>
    %54 = vector.shape_cast %51 : vector<8x75xf32> to vector<1x8x75xf32>
    tpu.vector_store %arg2[%c5, %c0_23, %c0_24], %54 {strides = array<i32>} : memref<6x8x75xf32, #tpu.memory_space<vmem>>, vector<1x8x75xf32>,
    return
  }
  func.func @transform_0(%arg0: i32) -> (i32, i32) {
    %c0_i32 = arith.constant 0 : i32
    %c0_i32_0 = arith.constant 0 : i32
    return %c0_i32, %arg0 : i32, i32
  }
  func.func @transform_1(%arg0: i32) -> (i32, i32, i32) {
    %c0_i32 = arith.constant 0 : i32
    %c0_i32_0 = arith.constant 0 : i32
    %c0_i32_1 = arith.constant 0 : i32
    return %c0_i32, %c0_i32_0, %arg0 : i32, i32, i32
  }
}

</mosaic_0001>

<bundles_post_ra>
// kernel: tpu_custom_call.1
= control target key start
LH: loop header
LB: loop body
LE: loop exit
PB: predicated region body
PF: predicated region fallthrough
CT: control target
= control target key end

     0   :  { %6 = vsyncpa [#allocation3], 0  ;;  %s165_s0 = inlined_call_operand.hbm [shape: f32[8,75], index: 0, kind: input, shape index: {}]   ;;  %s166_s1 = inlined_call_operand.hbm [shape: f32[6,8,75], index: 1, kind: output, shape index: {}]  }
   0x1   :  { %7 = vsyncpa [#allocation4], 0  ;;  %s145_s6 = smov [#allocation2]  }
   0x2   :  { %s14_s7 = sshll.u32 %s145_s6, 4  ;;  %s15_s7 = int_to_ptr.vmem [resolvable:$true] %s14_s7 }
   0x3   :  { %s109_s8 = scalar_lea.vmem %s15_s7, 128  ;;  %p114_p1 = scmp.lt.s32.totalorder %s15_s7, %s15_s7 }
   0x4   :  { %p110_p0 = scmp.ne.s32.totalorder %s15_s7, %s109_s8  ;;  %p115_p2 = scmp.lt.s32.totalorder %s109_s8, %s109_s8 }
   0x6   :  { %p116_p3 = por %p115_p2, %p114_p1 }
   0x8   :  { %p117_p4 = pnand %p116_p3, %p110_p0 }
   0xa   :  { %120 = shalt.err (!%p117_p4)
}
   0xb   :  { %17 = dma.hbm_to_vmem [thread:$0]  %s165_s0, 128, %s15_s7, [#allocation3]  }
   0xc   :  { %141 = dma.done.wait [#allocation3], 128  }
   0xd   :  { %142 = vsyncadd [#allocation3], 4294967168  ;;  %v21_v0 = vld [vmem:[#allocation2] sm:$0xff]  ;;  %vm26_vm0 = vcmask 613376   ;;  %s146_s0 = smov [#allocation5]  }
   0xe   :  { %v22_v1 = vmul.f32 -12.5, %v21_v0  ;;  %v80_v2 = vadd.f32 -0.2, %v21_v0  ;;  %v81_v3 = vadd.f32 -0.4, %v21_v0  ;;  %v84_v4 = vadd.f32 -1.0, %v21_v0 }
   0xf   :  { %v82_v5 = vadd.f32 -0.6, %v21_v0  ;;  %v83_v6 = vadd.f32 -0.8, %v21_v0  ;;  %s68_s11 = sshll.u32 %s146_s0, 4  ;;  %s69_s11 = int_to_ptr.vmem [resolvable:$true] %s68_s11 }
  0x10   :  { %v23_v7 = vmul.f32 %v22_v1, %v21_v0  ;;  %v29_v8 = vmul.f32 -12.5, %v80_v2  ;;  %v36_v9 = vmul.f32 -12.5, %v81_v3  ;;  %v57_v10 = vmul.f32 -12.5, %v84_v4  ;;  %s121_s12 = scalar_lea.vmem %s69_s11, 768  ;;  %p126_p6 = scmp.lt.s32.totalorder %s69_s11, %s69_s11 }
  0x11   :  { %v43_v11 = vmul.f32 -12.5, %v82_v5  ;;  %v50_v12 = vmul.f32 -12.5, %v83_v6  ;;  %p122_p5 = scmp.ne.s32.totalorder %s69_s11, %s121_s12  ;;  %p127_p7 = scmp.lt.s32.totalorder %s121_s12, %s121_s12 }
  0x12   :  { %v24_v13 = vmul.f32 1.442695, %v23_v7  ;;  %v30_v14 = vmul.f32 %v80_v2, %v29_v8  ;;  %v37_v15 = vmul.f32 %v81_v3, %v36_v9  ;;  %v58_v16 = vmul.f32 %v84_v4, %v57_v10 }
  0x13   :  { %v44_v17 = vmul.f32 %v82_v5, %v43_v11  ;;  %v51_v18 = vmul.f32 %v83_v6, %v50_v12  ;;  %p128_p8 = por %p127_p7, %p126_p6 }
  0x14   :  { %89 = vpow2.f32 %v24_v13  ;;  %v31_v19 = vmul.f32 1.442695, %v30_v14  ;;  %v38_v20 = vmul.f32 1.442695, %v37_v15  ;;  %v59_v23 = vmul.f32 1.442695, %v58_v16 }
  0x15   :  { %v45_v21 = vmul.f32 1.442695, %v44_v17  ;;  %v52_v22 = vmul.f32 1.442695, %v51_v18  ;;  %p129_p9 = pnand %p128_p8, %p122_p5 }
  0x16   :  { %91 = vpow2.f32 %v31_v19 }
  0x17   :  { %93 = vpow2.f32 %v38_v20 }
  0x18   :  { %95 = vpow2.f32 %v45_v21 }
  0x19   :  { %97 = vpow2.f32 %v52_v22 }
  0x1a   :  { %99 = vpow2.f32 %v59_v23 }
  0x21   :  { %v90_v24 = vpop.eup %89 }
  0x22   :  { %27 = vst.msk [vmem:[#allocation5] sm:$0xff] %vm26_vm0, %v90_v24 }
  0x23   :  { %v92_v25 = vpop.eup %91 }
  0x24   :  { %v94_v26 = vpop.eup %93  ;;  %34 = vst.msk [vmem:[#allocation5 + $0x8] sm:$0xff] %vm26_vm0, %v92_v25 }
  0x25   :  { %v96_v27 = vpop.eup %95  ;;  %41 = vst.msk [vmem:[#allocation5 + $0x10] sm:$0xff] %vm26_vm0, %v94_v26 }
  0x26   :  { %v98_v28 = vpop.eup %97  ;;  %48 = vst.msk [vmem:[#allocation5 + $0x18] sm:$0xff] %vm26_vm0, %v96_v27 }
  0x27   :  { %v100_v29 = vpop.eup %99  ;;  %55 = vst.msk [vmem:[#allocation5 + $0x20] sm:$0xff] %vm26_vm0, %v98_v28 }
  0x28   :  { %62 = vst.msk [vmem:[#allocation5 + $0x28] sm:$0xff] %vm26_vm0, %v100_v29 }
  0x29   :  { %132 = shalt.err (!%p129_p9)
}
  0x2a   :  { %s147_s13 = smov 128   ;;  %s148_s14 = smov 8  }
  0x2b   :  { %74 = dma.vmem_to_hbm [thread:$0]  %s69_s11, 768, %s166_s1, [#allocation4], %s147_s13, %s147_s13, %s148_s14  }
  0x2c   :  { %143 = dma.done.wait [#allocation4], 768  }
  0x2d   :  { %144 = vsyncadd [#allocation4], 4294966528 }
  0x2e   :  { %78 = vsyncpa [#allocation3], 1 }
  0x2f   :  { %79 = vsyncpa [#allocation4], 1 }

</bundles_post_ra>
